<compile_context>
chip_gen: v7x
topology: tpu7x:2x2x1
jax: 0.10.0
libtpu: 0.0.40
codegen_flags: <defaults>
</compile_context>

<pallas_src>
import jax
import jax.numpy as jnp
from jax.experimental import pallas as pl
from jax.experimental.pallas import tpu as pltpu


# ----------------------------------------------------------------------------
# Padding / tiling helpers
# ----------------------------------------------------------------------------
def _round_up(n, m):
    return ((n + m - 1) // m) * m


def _pad_and_tile(n, align, max_tile):
    """Return (padded_size, tile) with padded_size % tile == 0 and tile a
    multiple of `align` (max_tile must itself be a multiple of `align`)."""
    n_aligned = _round_up(n, align)
    if n_aligned <= max_tile:
        return n_aligned, n_aligned
    return _round_up(n, max_tile), max_tile


# ----------------------------------------------------------------------------
# Kernels
# ----------------------------------------------------------------------------
def _lws_matmul_kernel(x_ref, w_ref, b_ref, s_ref, o_ref, acc_ref):
    """Tiled  (x @ W + b) * scales  with f32 accumulator.

    x_ref: [tm, tk] bf16   w_ref: [tk, tn] bf16
    b_ref: [1, tn]  f32    s_ref: [1, tn]  f32
    o_ref: [tm, tn] f32    acc_ref: [tm, tn] f32 (VMEM scratch)
    Grid: (M/tm, N/tn, F/tk) with the reduction axis last ("arbitrary").
    """
    k = pl.program_id(2)

    @pl.when(k == 0)
    def _():
        acc_ref[...] = jnp.zeros_like(acc_ref)

    acc_ref[...] += jnp.dot(
        x_ref[...], w_ref[...], preferred_element_type=jnp.float32
    )

    @pl.when(k == pl.num_programs(2) - 1)
    def _():
        # Epilogue in f32 (v5e has no bf16 VPU path), applied once per tile.
        o_ref[...] = ((acc_ref[...] + b_ref[...]) * s_ref[...]).astype(o_ref.dtype)


def _lws_scale_kernel(x_ref, s_ref, o_ref):
    """only_fc path: elementwise  scales * x  on lane-dense padded blocks."""
    o_ref[...] = (x_ref[...] * s_ref[...]).astype(o_ref.dtype)


# ----------------------------------------------------------------------------
# Wrappers
# ----------------------------------------------------------------------------
def _backbone_logits_pallas(x_flat, w, b, scales):
    """Fused backbone-linear + bias + per-class scale.

    Pads (B, F, K) to sublane/lane/MXU-friendly sizes, runs a tiled
    (M, N, K-reduction) grid in bf16 with f32 accumulation, slices back.
    """
    B, F = x_flat.shape
    K = w.shape[1]

    M_pad, tm = _pad_and_tile(B, 8, 256)     # sublane-aligned batch
    N_pad, tn = _pad_and_tile(K, 128, 256)   # lane-dense classes
    F_pad, tk = _pad_and_tile(F, 128, 512)   # reduction tile

    # bf16 MXU operands; zero padding keeps the math identical.
    x_p = jnp.zeros((M_pad, F_pad), jnp.bfloat16).at[:B, :F].set(
        x_flat.astype(jnp.bfloat16))
    w_p = jnp.zeros((F_pad, N_pad), jnp.bfloat16).at[:F, :K].set(
        w.astype(jnp.bfloat16))
    # b padded with 0, scales padded with 1 so padded lanes stay inert.
    b_p = jnp.zeros((1, N_pad), jnp.float32).at[0, :K].set(
        b.astype(jnp.float32))
    s_p = jnp.ones((1, N_pad), jnp.float32).at[0, :K].set(
        scales.astype(jnp.float32))

    grid = (M_pad // tm, N_pad // tn, F_pad // tk)

    out = pl.pallas_call(
        _lws_matmul_kernel,
        out_shape=jax.ShapeDtypeStruct((M_pad, N_pad), jnp.float32),
        grid_spec=pltpu.PrefetchScalarGridSpec(
            num_scalar_prefetch=0,
            grid=grid,
            in_specs=[
                pl.BlockSpec((tm, tk), lambda i, j, k: (i, k)),
                pl.BlockSpec((tk, tn), lambda i, j, k: (k, j)),
                pl.BlockSpec((1, tn), lambda i, j, k: (0, j)),
                pl.BlockSpec((1, tn), lambda i, j, k: (0, j)),
            ],
            out_specs=pl.BlockSpec((tm, tn), lambda i, j, k: (i, j)),
            scratch_shapes=[pltpu.VMEM((tm, tn), jnp.float32)],
        ),
        compiler_params=pltpu.CompilerParams(
            dimension_semantics=("parallel", "parallel", "arbitrary")),
    )(x_p, w_p, b_p, s_p)

    return out[:B, :K]


def _scale_only_pallas(x, scales):
    """only_fc path: scales * x with lane/sublane-dense padding, no grid."""
    B, K = x.shape
    B_pad = _round_up(B, 8)
    K_pad = _round_up(K, 128)

    x_p = jnp.zeros((B_pad, K_pad), jnp.float32).at[:B, :K].set(
        x.astype(jnp.float32))
    s_p = jnp.ones((1, K_pad), jnp.float32).at[0, :K].set(
        scales.astype(jnp.float32))

    out = pl.pallas_call(
        _lws_scale_kernel,
        out_shape=jax.ShapeDtypeStruct((B_pad, K_pad), jnp.float32),
        in_specs=[
            pl.BlockSpec(memory_space=pltpu.MemorySpace.VMEM),
            pl.BlockSpec(memory_space=pltpu.MemorySpace.VMEM),
        ],
        out_specs=pl.BlockSpec(memory_space=pltpu.MemorySpace.VMEM),
    )(x_p, s_p)
    return out[:B, :K]


class LwsNetPallas:
    """JAX/Pallas equivalent of Lws_Net with a synthetic linear backbone."""
    # TODO(synk): PyTorch injects an arbitrary backbone `base`; only a linear
    # backbone is implemented here (conv/resnet backbones are out of scope).

    def __init__(self, in_features, num_classes, key):
        k_w, k_b = jax.random.split(key)
        self.w = (jax.random.normal(k_w, (in_features, num_classes), jnp.float32)
                  * (1.0 / jnp.sqrt(in_features)))
        self.b = jax.random.normal(k_b, (num_classes,), jnp.float32) * 0.01
        # nn.Parameter(torch.ones(num_classes))
        self.scales = jnp.ones((num_classes,), jnp.float32)
        self.num_classes = num_classes

    def _flatten(self, x):
        # NCHW -> [B, C*H*W], matching torch .view(B, -1) row-major semantics
        B = x.shape[0]
        return x.reshape(B, -1).astype(jnp.float32)

    def __call__(self, x, only_feat=False, only_fc=False):
        if only_feat:
            # backbone(x)['logits'] without scaling -> pass ones as scales
            x_flat = self._flatten(x)
            ones = jnp.ones_like(self.scales)
            return _backbone_logits_pallas(x_flat, self.w, self.b, ones)
        if only_fc:
            # scales * x  (x already logits-shaped [B, num_classes])
            return _scale_only_pallas(x.astype(jnp.float32), self.scales)
        x_flat = self._flatten(x)
        logits = _backbone_logits_pallas(x_flat, self.w, self.b, self.scales)
        return {"logits": logits}


# ----------------------------------------------------------------------------
# Main
# ----------------------------------------------------------------------------
if __name__ == "__main__":
    key = jax.random.PRNGKey(0)
    k_x, k_params, k_fc = jax.random.split(key, 3)

    B, C, H, W = 2, 4, 16, 16
    num_classes = 10
    x = jax.random.normal(k_x, (B, C, H, W), jnp.float32)

    model = LwsNetPallas(in_features=C * H * W, num_classes=num_classes, key=k_params)

    # default path: {'logits': scales * backbone(x)['logits']}
    out = model(x)
    logits = jax.block_until_ready(out["logits"])
    assert logits.shape == (B, num_classes)

    # only_feat path
    feats = jax.block_until_ready(model(x, only_feat=True))
    assert feats.shape == (B, num_classes)

    # only_fc path: scales * x  (x is already [B, num_classes])
    x_fc = jax.random.normal(k_fc, (B, num_classes), jnp.float32)
    scaled = jax.block_until_ready(model(x_fc, only_fc=True))
    assert scaled.shape == (B, num_classes)

    # ---- reference checks ----
    x_flat = x.reshape(B, -1)

    # Tight check vs. a bf16-operand / f32-accumulate reference (same MXU path).
    ref_bf16 = (jnp.dot(x_flat.astype(jnp.bfloat16), model.w.astype(jnp.bfloat16),
                        preferred_element_type=jnp.float32)
                + model.b) * model.scales
    assert jnp.allclose(logits, ref_bf16, atol=1e-3, rtol=1e-3)

    # Loose sanity check vs. the full-f32 reference (bounds bf16 rounding error).
    ref_f32 = (x_flat @ model.w + model.b) * model.scales
    assert jnp.allclose(logits, ref_f32, atol=5e-2, rtol=5e-2)

    # only_feat == logits / scales (scales are ones here, so identical path)
    assert jnp.allclose(feats * model.scales, logits, atol=1e-6)

    # only_fc exact elementwise check
    assert jnp.allclose(scaled, x_fc * model.scales, atol=1e-6)

    print("KERNEL_OK")
</pallas_src>

<mosaic_0001>
module attributes {stable_mosaic.version = 11 : i64} {
  func.func @_lws_matmul_kernel(%arg0: i32, %arg1: i32, %arg2: i32, %arg3: memref<8x512xbf16, #tpu.memory_space<vmem>>, %arg4: memref<512x128xbf16, #tpu.memory_space<vmem>>, %arg5: memref<1x128xf32, #tpu.memory_space<vmem>>, %arg6: memref<1x128xf32, #tpu.memory_space<vmem>>, %arg7: memref<8x128xf32, #tpu.memory_space<vmem>>, %arg8: memref<8x128xf32, #tpu.memory_space<vmem>>) attributes {dimension_semantics = [#tpu.dimension_semantics<parallel>, #tpu.dimension_semantics<parallel>, #tpu.dimension_semantics<arbitrary>], iteration_bounds = array<i64: 1, 1, 2>, scalar_prefetch = 0 : i64, scratch_operands = 1 : i64, tpu.core_type = #tpu.core_type<tc>, window_params = [{transform_indices = @transform_0, window_bounds = array<i64: 8, 512>}, {transform_indices = @transform_1, window_bounds = array<i64: 512, 128>}, {transform_indices = @transform_2, window_bounds = array<i64: 1, 128>}, {transform_indices = @transform_3, window_bounds = array<i64: 1, 128>}, {transform_indices = @transform_4, window_bounds = array<i64: 8, 128>}]} {
    %c0_i32 = arith.constant 0 : i32
    %0 = arith.cmpi eq, %arg2, %c0_i32 : i32
    %1 = arith.extui %0 : i1 to i32
    %c0_i32_0 = arith.constant 0 : i32
    %2 = arith.cmpi ne, %1, %c0_i32_0 : i32
    scf.if %2 {
      %cst_9 = arith.constant 0.000000e+00 : f32
      %12 = vector.broadcast %cst_9 : f32 to vector<8x128xf32>
      %c0_10 = arith.constant 0 : index
      %c0_11 = arith.constant 0 : index
      %13 = vector.load %arg8[%c0_10, %c0_11] : memref<8x128xf32, #tpu.memory_space<vmem>>, vector<8x128xf32>
      tpu.vector_store %arg8[%c0_10, %c0_11], %12 {strides = array<i32>} : memref<8x128xf32, #tpu.memory_space<vmem>>, vector<8x128xf32>,
    } else {
    }
    %c0 = arith.constant 0 : index
    %c0_1 = arith.constant 0 : index
    %3 = vector.load %arg8[%c0, %c0_1] : memref<8x128xf32, #tpu.memory_space<vmem>>, vector<8x128xf32>
    %c0_2 = arith.constant 0 : index
    %c0_3 = arith.constant 0 : index
    %4 = vector.load %arg3[%c0_2, %c0_3] : memref<8x512xbf16, #tpu.memory_space<vmem>>, vector<8x512xbf16>
    %c0_4 = arith.constant 0 : index
    %c0_5 = arith.constant 0 : index
    %5 = vector.load %arg4[%c0_4, %c0_5] : memref<512x128xbf16, #tpu.memory_space<vmem>>, vector<512x128xbf16>
    %cst = arith.constant dense<0.000000e+00> : vector<8x128xf32>
    %6 = tpu.matmul %4, %5, %cst {dimension_numbers = #tpu.dot_dimension_numbers<[1], [0], [0], [1], [0, 0, 1, 1], [], []>} : vector<8x512xbf16>, vector<512x128xbf16>, vector<8x128xf32> -> vector<8x128xf32>
    %7 = arith.addf %3, %6 : vector<8x128xf32>
    %c0_6 = arith.constant 0 : index
    %c0_7 = arith.constant 0 : index
    %8 = vector.load %arg8[%c0_6, %c0_7] : memref<8x128xf32, #tpu.memory_space<vmem>>, vector<8x128xf32>
    tpu.vector_store %arg8[%c0_6, %c0_7], %7 {strides = array<i32>} : memref<8x128xf32, #tpu.memory_space<vmem>>, vector<8x128xf32>,
    %c1_i32 = arith.constant 1 : i32
    %9 = arith.cmpi eq, %arg2, %c1_i32 : i32
    %10 = arith.extui %9 : i1 to i32
    %c0_i32_8 = arith.constant 0 : i32
    %11 = arith.cmpi ne, %10, %c0_i32_8 : i32
    scf.if %11 {
      %c0_9 = arith.constant 0 : index
      %c0_10 = arith.constant 0 : index
      %12 = vector.load %arg8[%c0_9, %c0_10] : memref<8x128xf32, #tpu.memory_space<vmem>>, vector<8x128xf32>
      %c0_11 = arith.constant 0 : index
      %c0_12 = arith.constant 0 : index
      %13 = vector.load %arg5[%c0_11, %c0_12] : memref<1x128xf32, #tpu.memory_space<vmem>>, vector<1x128xf32>
      %14 = vector.broadcast %13 : vector<1x128xf32> to vector<8x128xf32>
      %15 = arith.addf %12, %14 : vector<8x128xf32>
      %c0_13 = arith.constant 0 : index
      %c0_14 = arith.constant 0 : index
      %16 = vector.load %arg6[%c0_13, %c0_14] : memref<1x128xf32, #tpu.memory_space<vmem>>, vector<1x128xf32>
      %17 = vector.broadcast %16 : vector<1x128xf32> to vector<8x128xf32>
      %18 = arith.mulf %15, %17 : vector<8x128xf32>
      %c0_15 = arith.constant 0 : index
      %c0_16 = arith.constant 0 : index
      %19 = vector.load %arg7[%c0_15, %c0_16] : memref<8x128xf32, #tpu.memory_space<vmem>>, vector<8x128xf32>
      tpu.vector_store %arg7[%c0_15, %c0_16], %18 {strides = array<i32>} : memref<8x128xf32, #tpu.memory_space<vmem>>, vector<8x128xf32>,
    } else {
    }
    return
  }
  func.func @transform_0(%arg0: i32, %arg1: i32, %arg2: i32) -> (i32, i32) {
    %c0_i32 = arith.constant 0 : i32
    return %arg0, %arg2 : i32, i32
  }
  func.func @transform_1(%arg0: i32, %arg1: i32, %arg2: i32) -> (i32, i32) {
    %c0_i32 = arith.constant 0 : i32
    return %arg2, %arg1 : i32, i32
  }
  func.func @transform_2(%arg0: i32, %arg1: i32, %arg2: i32) -> (i32, i32) {
    %c0_i32 = arith.constant 0 : i32
    %c0_i32_0 = arith.constant 0 : i32
    return %c0_i32, %arg1 : i32, i32
  }
  func.func @transform_3(%arg0: i32, %arg1: i32, %arg2: i32) -> (i32, i32) {
    %c0_i32 = arith.constant 0 : i32
    %c0_i32_0 = arith.constant 0 : i32
    return %c0_i32, %arg1 : i32, i32
  }
  func.func @transform_4(%arg0: i32, %arg1: i32, %arg2: i32) -> (i32, i32) {
    %c0_i32 = arith.constant 0 : i32
    return %arg0, %arg1 : i32, i32
  }
}

</mosaic_0001>

<bundles_post_ra>
// kernel: tpu_custom_call.1
= control target key start
LH: loop header
LB: loop body
LE: loop exit
PB: predicated region body
PF: predicated region fallthrough
CT: control target
= control target key end

     0   :  { %9 = vsyncpa [#allocation4], 0  ;;  %s1447_s0 = inlined_call_operand.hbm [shape: bf16[8,1024], index: 0, kind: input, shape index: {}]   ;;  %s1448_s1 = inlined_call_operand.hbm [shape: bf16[1024,128], index: 1, kind: input, shape index: {}]   ;;  %s1449_s2 = inlined_call_operand.vmem [shape: f32[1,128], index: 2, kind: input, shape index: {}]   ;;  %s1450_s3 = inlined_call_operand.vmem [shape: f32[1,128], index: 3, kind: input, shape index: {}]   ;;  %s1451_s4 = inlined_call_operand.hbm [shape: f32[8,128], index: 4, kind: output, shape index: {}]  }
   0x1   :  { %11 = vsyncpa [#allocation4 + $0x1], 0 }
   0x2   :  { %12 = vsyncpa [#allocation7], 0 }
   0x3   :  { %14 = vsyncpa [#allocation7 + $0x1], 0 }
   0x4   :  { %15 = vsyncpa [#allocation5], 0  ;;  %s1202_s15 = smov 0   ;;  %s1204_s16 = smov 0  }
   0x5   :  { %s1206_s17 = smov 0   ;;  %s1208_s18 = smov 0  }
   0x6   :  { %s1210_s19 = smov 0   ;;  %s1212_s20 = smov 0  }
   0x7 LB: > { %s815_s21 = sadd.s32 4294967295, %s1169_s20   ;;  %s33_s22 = sadd.s32 1, %s1165_s19  ;;  %s1169_s20 = sphi %s1212_s20, %s21_s20   ;;  %s1165_s19 = sphi %s1210_s19, %s1465_s19   ;;  %s1161_s18 = sphi %s1208_s18, %s1464_s18   ;;  %s1157_s17 = sphi %s1206_s17, %s1463_s17   ;;  %s1153_s16 = sphi %s1204_s16, %s1462_s16   ;;  %s1149_s15 = sphi %s1202_s15, %s1461_s15  }
   0x8   : > { %p34_p0 = scmp.ge.s32.totalorder %s33_s22, 2  ;;  %s49_s23 = sadd.s32 1, %s1157_s17 }
   0x9   : > { %p56_p1 = scmp.ne.s32.totalorder %s1157_s17, %s1153_s16  ;;  %p57_p2 = scmp.eq.s32.totalorder %s1169_s20, 0 }
   0xa   : > { %s1467_s22 = smov (%p34_p0, %s33_s22), 0  ;;  %p62_p4 = scmp.ne.s32.totalorder %s1153_s16, %s1149_s15 }
   0xb   : > { %p1238_p3 = por %p57_p2, %p56_p1  ;;  %s45_s25 = ssub.s32 %s1165_s19, %s1467_s22 }
   0xc   : > { %p63_p5 = scmp.eq.s32.totalorder %s815_s21, 0  ;;  %p47_p6 = scmp.eq.s32.totalorder %s45_s25, 0 }
   0xd   : > { %p934_p8 = scmp.lt.s32.totalorder %s1169_s20, 2  ;;  %s1256_s28 = sand.u32 1, %s1157_s17  }
   0xe   : > { %p1247_p7 = por %p63_p5, %p62_p4  ;;  %s873_s29 = sshll.u32 %s1165_s19, 8 }
   0xf   : > { %s1253_s27 = scalar_select %p47_p6, %s1157_s17, %s49_s23  }
  0x10   : > { %s1454_s26 = scalar_select %p1247_p7, 1, 0 }
  0x11   : > { %s820_s30 = sshll.u32 %s1256_s28, 4  ;;  %s1263_s7 = scalar_lea.hbm %s1447_s0, %s873_s29 }
  0x12   : > { %s210_s8 = scalar_lea.vmem [#allocation3], %s820_s30  ;;  %p1267_p9 = pnand %p934_p8, %p1238_p3 }
  0x13   : > { %s220_s9 = sshll.u32 %s210_s8, 4  ;;  %s207_s11 = scalar_lea.sflag [#allocation4], %s1256_s28  ;;  %s1271_s9 = int_to_ptr.vmem [resolvable:$true] %s220_s9 }
  0x14   : > { %s1025_s12 = scalar_lea.hbm %s1263_s7, 256  ;;  %p1027_p13 = pneg %p1267_p9 }
  0x15   : > { %p1026_p12 = scmp.ne.s32.totalorder %s1263_s7, %s1025_s12  ;;  %s1030_s15 = scalar_lea.hbm %s1447_s0, 512 }
  0x16   : > { %p1031_p2 = scmp.lt.u32.totalorder %s1263_s7, %s1447_s0  ;;  %p1032_p3 = scmp.lt.u32.totalorder %s1030_s15, %s1025_s12 }
  0x17   : > { %p1028_p0 = pnand %p1027_p13, %p1026_p12  ;;  %p1034_p5 = scmp.lt.u32.totalorder %s1025_s12, %s1263_s7 }
  0x18   : > { %p1033_p4 = por %p1032_p3, %p1031_p2 }
  0x19   : > { %p1029_p1 = pneg %p1028_p0 }
  0x1a   : > { %p1035_p6 = por %p1034_p5, %p1033_p4 }
  0x1c   : > { %p1036_p8 = pnand %p1035_p6, %p1029_p1 }
  0x1e   : > { %1039 = shalt.err (!%p1036_p8)
}
  0x1f   : > { %s1040_s25 = scalar_lea.vmem %s1271_s9, 256  ;;  %s1171_s29 = smov [#allocation3]  }
  0x20   : > { %p1041_p12 = scmp.ne.s32.totalorder %s1271_s9, %s1040_s25  ;;  %s1045_s30 = sshll.u32 %s1171_s29, 4  ;;  %s1046_s30 = int_to_ptr.vmem [resolvable:$false] %s1045_s30 }
  0x21   : > { %s1047_s5 = scalar_lea.vmem %s1046_s30, 512  ;;  %p1048_p11 = scmp.lt.s32.totalorder %s1271_s9, %s1046_s30 }
  0x22   : > { %p1043_p0 = pnand %p1041_p12, %p1027_p13  ;;  %p1049_p2 = scmp.lt.s32.totalorder %s1047_s5, %s1040_s25 }
  0x24   : > { %p1044_p10 = pneg %p1043_p0  ;;  %p1050_p3 = por %p1049_p2, %p1048_p11 }
  0x26   : > { %p1051_p4 = pnand %p1050_p3, %p1044_p10 }
  0x28   : > { %1054 = shalt.err (!%p1051_p4)
}
  0x29   : > { %930 = dma.hbm_to_vmem [thread:$0]  (!%p1267_p9), %s1263_s7, 256, %s1271_s9, %s207_s11  }
  0x2a   : > { %p1456_p1 = scmp.lt.s32.totalorder %s1169_s20, 3  ;;  %p1457_p5 = scmp.ge.s32.totalorder %s1169_s20, 1 }
  0x2b   : > { %s823_s8 = sshll.u32 %s1256_s28, 8  ;;  %s874_s12 = sshll.u32 %s1165_s19, 12 }
  0x2c   : > { %p1305_p6 = pnand %p1457_p5, %p1456_p1  ;;  %s1314_s15 = scalar_lea.hbm %s1448_s1, %s874_s12 }
  0x2d   : > { %s231_s23 = scalar_lea.vmem [#allocation6], %s823_s8  ;;  %s228_s7 = scalar_lea.sflag [#allocation7], %s1256_s28 }
  0x2e   : > { %s239_s24 = sshll.u32 %s231_s23, 4  ;;  %s1055_s9 = scalar_lea.hbm %s1314_s15, 4096  ;;  %s1316_s24 = int_to_ptr.vmem [resolvable:$true] %s239_s24 }
  0x2f   : > { %p1056_p10 = scmp.ne.s32.totalorder %s1314_s15, %s1055_s9  ;;  %s1060_s29 = scalar_lea.hbm %s1448_s1, 8192 }
  0x30   : > { %p1061_p12 = scmp.lt.u32.totalorder %s1314_s15, %s1448_s1  ;;  %p1062_p0 = scmp.lt.u32.totalorder %s1060_s29, %s1055_s9 }
  0x31   : > { %p1058_p11 = pnand %p1056_p10, %p1027_p13  ;;  %p1064_p3 = scmp.lt.u32.totalorder %s1055_s9, %s1314_s15 }
  0x32   : > { %p1063_p2 = por %p1062_p0, %p1061_p12 }
  0x33   : > { %p1059_p8 = pneg %p1058_p11 }
  0x34   : > { %p1065_p4 = por %p1064_p3, %p1063_p2 }
  0x36   : > { %p1066_p1 = pnand %p1065_p4, %p1059_p8 }
  0x38   : > { %1069 = shalt.err (!%p1066_p1)
}
  0x39   : > { %s1070_s8 = scalar_lea.vmem %s1316_s24, 4096  ;;  %s1172_s12 = smov [#allocation6]  }
  0x3a   : > { %p1071_p5 = scmp.ne.s32.totalorder %s1316_s24, %s1070_s8  ;;  %s1075_s13 = sshll.u32 %s1172_s12, 4  ;;  %s1076_s13 = int_to_ptr.vmem [resolvable:$false] %s1075_s13 }
  0x3b   : > { %s1077_s14 = scalar_lea.vmem %s1076_s13, 8192  ;;  %p1078_p7 = scmp.lt.s32.totalorder %s1316_s24, %s1076_s13 }
  0x3c   : > { %p1073_p10 = pnand %p1071_p5, %p1027_p13  ;;  %p1079_p12 = scmp.lt.s32.totalorder %s1077_s14, %s1070_s8 }
  0x3e   : > { %p1074_p11 = pneg %p1073_p10  ;;  %p1080_p0 = por %p1079_p12, %p1078_p7 }
  0x40   : > { %p1081_p2 = pnand %p1080_p0, %p1074_p11 }
  0x42   : > { %1084 = shalt.err (!%p1081_p2)
}
  0x43   : > { %s1173_s23 = smov 64   ;;  %s1174_s9 = smov 4  }
  0x44   : > { %933 = dma.hbm_to_vmem [thread:$0]  (!%p1267_p9), %s1314_s15, 4096, %s1316_s24, %s228_s7, %s1173_s23, %s1173_s23, %s1174_s9  }
  0x45   : > { %251 = sbr.rel (%p1305_p6) target bundleno = 381 (0x17d), region = 36  ;;  %s253_s11 = sand.u32 (!%p1305_p6), 1, %s1153_s16  }
  0x46   : > { %s827_s25 = sshll.u32 (!%p1305_p6), %s253_s11, 4  ;;  %s254_s29 = scalar_lea.sflag (!%p1305_p6), [#allocation4], %s253_s11 }
  0x47   : > { %s1347_s30 = scalar_lea.vmem (!%p1305_p6), [#allocation3], %s827_s25  ;;  %p1459_p7 = scmp.ne.s32.totalorder (!%p1305_p6), %s1454_s26, 0 }
  0x4c   : > { %1136 = dma.done.wait (%p1459_p7), %s254_s29, 256  }
  0x4d   : > { %1138 = vsyncadd (%p1459_p7), %s254_s29, 4294967040  ;;  %s828_s5 = sshll.u32 %s253_s11, 8  ;;  %s263_s10 = scalar_lea.sflag [#allocation7], %s253_s11 }
  0x4e   : > { %s1353_s28 = scalar_lea.vmem [#allocation6], %s828_s5 }
  0x4f   : > { %1140 = dma.done.wait (%p1459_p7), %s263_s10, 4096  }
  0x50   : > { %1142 = vsyncadd (%p1459_p7), %s263_s10, 4294963200  ;;  %p829_p9 = scmp.ne.s32.totalorder %s1161_s18, 0 }
  0x51   : > { %v1175_v0 = vmov (!%p829_p9), 0.0  }
  0x52   : > { %309 = sbr.rel (%p829_p9) target bundleno = 89 (0x59), region = 48  ;;  %310 = vst [vmem:[#allocation2] sm:$0xff] (!%p829_p9), %v1175_v0 }
  0x59 PF: > { %v989_v1 = vld [vmem:[%s1353_s28 + $0x40] sm:$0xff]   ;;  %v993_v5 = vld [vmem:[%s1353_s28 + $0x48] sm:$0xff]   ;;  %v997_v9 = vld [vmem:[%s1353_s28 + $0x50] sm:$0xff]   ;;  %p866_p13 = scmp.ne.s32.totalorder %s1161_s18, 1 }
  0x5a   : > { %v990_v2 = vld [vmem:[%s1353_s28 + $0xc0] sm:$0xff]   ;;  %875 = vmatprep.subr.bf16.mxu0 %v989_v1  ;;  %v994_v6 = vld [vmem:[%s1353_s28 + $0xc8] sm:$0xff]   ;;  %v998_v10 = vld [vmem:[%s1353_s28 + $0xd0] sm:$0xff]  }
  0x5b   : > { %v991_v3 = vld [vmem:[%s1353_s28] sm:$0xff]   ;;  %897 = vmatprep.subr.bf16.mxu1 %v990_v2  ;;  %v995_v7 = vld [vmem:[%s1353_s28 + $0x8] sm:$0xff]   ;;  %v999_v11 = vld [vmem:[%s1353_s28 + $0x10] sm:$0xff]  }
  0x5c   : > { %v992_v4 = vld [vmem:[%s1353_s28 + $0x80] sm:$0xff]   ;;  %876 = vmatpush3.bf16.msra.mxu0 %v991_v3  ;;  %v996_v8 = vld [vmem:[%s1353_s28 + $0x88] sm:$0xff]   ;;  %v1000_v12 = vld [vmem:[%s1353_s28 + $0x90] sm:$0xff]  }
  0x5d   : > { %898 = vmatpush3.bf16.msra.mxu1 %v992_v4  ;;  %877 = vmatprep.subr.bf16.mxu0 %v993_v5  ;;  %v1001_v13 = vld [vmem:[%s1353_s28 + $0x58] sm:$0xff]   ;;  %v1005_v17 = vld [vmem:[%s1353_s28 + $0x60] sm:$0xff]   ;;  %v1009_v21 = vld [vmem:[%s1353_s28 + $0x68] sm:$0xff]  }
  0x5e   : > { %899 = vmatprep.subr.bf16.mxu1 %v994_v6  ;;  %v1002_v14 = vld [vmem:[%s1353_s28 + $0xd8] sm:$0xff]   ;;  %v1006_v18 = vld [vmem:[%s1353_s28 + $0xe0] sm:$0xff]   ;;  %v1010_v22 = vld [vmem:[%s1353_s28 + $0xe8] sm:$0xff]  }
  0x5f   : > { %v1003_v15 = vld [vmem:[%s1353_s28 + $0x18] sm:$0xff]   ;;  %v1007_v19 = vld [vmem:[%s1353_s28 + $0x20] sm:$0xff]   ;;  %v1011_v23 = vld [vmem:[%s1353_s28 + $0x28] sm:$0xff]  }
  0x60   : > { %878 = vmatpush3.bf16.msra.mxu0 %v995_v7  ;;  %v1004_v16 = vld [vmem:[%s1353_s28 + $0x98] sm:$0xff]   ;;  %v1008_v20 = vld [vmem:[%s1353_s28 + $0xa0] sm:$0xff]   ;;  %v1012_v24 = vld [vmem:[%s1353_s28 + $0xa8] sm:$0xff]  }
  0x61   : > { %900 = vmatpush3.bf16.msra.mxu1 %v996_v8  ;;  %879 = vmatprep.subr.bf16.mxu0 %v997_v9  ;;  %v1013_v25 = vld [vmem:[%s1353_s28 + $0x70] sm:$0xff]   ;;  %v1017_v29 = vld [vmem:[%s1353_s28 + $0x78] sm:$0xff]  }
  0x62   : > { %901 = vmatprep.subr.bf16.mxu1 %v998_v10  ;;  %v1014_v26 = vld [vmem:[%s1353_s28 + $0xf0] sm:$0xff]   ;;  %v1018_v30 = vld [vmem:[%s1353_s28 + $0xf8] sm:$0xff]  }
  0x63   : > { %v1015_v27 = vld [vmem:[%s1353_s28 + $0x30] sm:$0xff]   ;;  %v1019_v31 = vld [vmem:[%s1353_s28 + $0x38] sm:$0xff]  }
  0x64   : > { %880 = vmatpush3.bf16.msra.mxu0 %v999_v11  ;;  %v1016_v28 = vld [vmem:[%s1353_s28 + $0xb0] sm:$0xff]   ;;  %v1020_v32 = vld [vmem:[%s1353_s28 + $0xb8] sm:$0xff]  }
  0x65   : > { %902 = vmatpush3.bf16.msra.mxu1 %v1000_v12  ;;  %881 = vmatprep.subr.bf16.mxu0 %v1001_v13  ;;  %v312_v33 = vld [vmem:[%s1347_s30] sm:$0xff]  ;;  %v313_v34 = vld [vmem:[%s1347_s30 + $0x8] sm:$0xff] }
  0x66   : > { %903 = vmatprep.subr.bf16.mxu1 %v1002_v14  ;;  %v830_v35 = vcombine.low %v312_v33, %v312_v33  ;;  %v831_v36 = vcombine.high %v312_v33, %v312_v33  ;;  %v832_v37 = vcombine.low %v313_v34, %v313_v34  ;;  %v833_v38 = vcombine.high %v313_v34, %v313_v34  ;;  %v311_v47 = vld [vmem:[#allocation2] sm:$0xff] }
  0x67   : > { %v867_v53 = vld [vmem:[%s1449_s2] ss:$0 sm:$0xff] (!%p866_p13) }
  0x68   : > { %882 = vmatpush3.bf16.msra.mxu0 %v1003_v15  ;;  %616 = vmatprep.mubr.bf16.mxu0 %v831_v36  ;;  %v868_v54 = vld [vmem:[%s1450_s3] ss:$0 sm:$0xff] (!%p866_p13) }
  0x69   : > { %904 = vmatpush3.bf16.msra.mxu1 %v1004_v16  ;;  %883 = vmatprep.subr.bf16.mxu0 %v1005_v17 }
  0x6a   : > { %905 = vmatprep.subr.bf16.mxu1 %v1006_v18  ;;  %656 = vmatprep.mubr.bf16.mxu1 %v833_v38 }
  0x6c   : > { %884 = vmatpush3.bf16.msra.mxu0 %v1007_v19 }
  0x6d   : > { %906 = vmatpush3.bf16.msra.mxu1 %v1008_v20  ;;  %885 = vmatprep.subr.bf16.mxu0 %v1009_v21 }
  0x6e   : > { %907 = vmatprep.subr.bf16.mxu1 %v1010_v22 }
  0x70   : > { %886 = vmatpush3.bf16.msra.mxu0 %v1011_v23 }
  0x71   : > { %908 = vmatpush3.bf16.msra.mxu1 %v1012_v24  ;;  %887 = vmatprep.subr.bf16.mxu0 %v1013_v25 }
  0x72   : > { %909 = vmatprep.subr.bf16.mxu1 %v1014_v26 }
  0x74   : > { %888 = vmatpush3.bf16.msra.mxu0 %v1015_v27 }
  0x75   : > { %910 = vmatpush3.bf16.msra.mxu1 %v1016_v28  ;;  %889 = vmatprep.subr.bf16.mxu0 %v1017_v29 }
  0x76   : > { %911 = vmatprep.subr.bf16.mxu1 %v1018_v30 }
  0x78   : > { %890 = vmatpush3.bf16.msra.mxu0 %v1019_v31 }
  0x79   : > { %912 = vmatpush3.bf16.msra.mxu1 %v1020_v32 }
  0x7b   : > { %617 = vmatmul.mubr.bf16.vlgmr.msra.gmra.mrb[0].mxu0 %v830_v35 }
  0x7c   : > { %657 = vmatmul.mubr.bf16.vlgmr.msra.gmra.mrb[0].mxu1 %v832_v37 }
 0x14e   : > { %v891_v39 = vpop.f32.mrb[0].mxu0 }
 0x14f   : > { %v913_v40 = vpop.f32.mrb[0].mxu1  ;;  %v892_v41 = vpop.f32.mrb[1].mxu0 }
 0x150   : > { %v914_v42 = vpop.f32.mrb[1].mxu1  ;;  %v893_v43 = vadd.f32 %v892_v41, %v891_v39  ;;  %v894_v45 = vpop.f32.mrb[2].mxu0 }
 0x151   : > { %v915_v44 = vadd.f32 %v914_v42, %v913_v40  ;;  %v916_v46 = vpop.f32.mrb[2].mxu1  ;;  %v895_v48 = vpop.f32.mrb[3].mxu0  ;;  %669 = sbr.rel (%p866_p13) target bundleno = 356 (0x164), region = 52 }
 0x152   : > { %v917_v49 = vpop.f32.mrb[3].mxu1 }
 0x153   : > { %v659_v50 = vadd.f32 %v915_v44, %v893_v43 }
 0x155   : > { %v664_v51 = vadd.f32 %v659_v50, %v311_v47 }
 0x157   : > { %665 = vst [vmem:[#allocation2] sm:$0xff] %v664_v51 }
 0x15e   : > { %v670_v52 = vld [vmem:[#allocation2] sm:$0xff] }
 0x15f   : > { %v678_v55 = vadd.f32 %v867_v53, %v670_v52 }
 0x161   : > { %v686_v56 = vmul.f32 %v868_v54, %v678_v55 }
 0x163   : > { %687 = vst [vmem:[#allocation8] sm:$0xff] %v686_v56 }
 0x164 PF: > { %p1403_p6 = scmp.eq.s32.totalorder %s815_s21, 1  ;;  %s1176_s18 = smov [#allocation8]  }
 0x165   : > { %s698_s8 = sshll.u32 %s1176_s18, 4  ;;  %s699_s8 = int_to_ptr.vmem [resolvable:$true] %s698_s8 }
 0x166   : > { %s1085_s12 = scalar_lea.vmem %s699_s8, 128  ;;  %p1092_p1 = scmp.lt.s32.totalorder %s699_s8, %s699_s8 }
 0x167   : > { %p1086_p8 = scmp.ne.s32.totalorder %s699_s8, %s1085_s12  ;;  %p1093_p5 = scmp.lt.s32.totalorder %s1085_s12, %s1085_s12 }
 0x169   : > { %p1087_p3 = pnand %p1086_p8, %p1403_p6  ;;  %p1094_p10 = por %p1093_p5, %p1092_p1 }
 0x16b   : > { %p1088_p4 = pneg %p1087_p3 }
 0x16d   : > { %p1095_p11 = pnand %p1094_p10, %p1088_p4 }
 0x16f   : > { %1098 = shalt.err (!%p1095_p11)
}
 0x170   : > { %s1099_s21 = scalar_lea.hbm %s1451_s4, 128 }
 0x171   : > { %p1100_p12 = scmp.ne.s32.totalorder %s1451_s4, %s1099_s21  ;;  %p1105_p7 = scmp.lt.u32.totalorder %s1099_s21, %s1451_s4 }
 0x173   : > { %p1101_p0 = pnand %p1100_p12, %p1403_p6 }
 0x175   : > { %p1102_p2 = pneg %p1101_p0 }
 0x177   : > { %p1107_p9 = pnand %p1105_p7, %p1102_p2 }
 0x179   : > { %1110 = shalt.err (!%p1107_p9)
}
 0x17a   : > { %924 = dma.vmem_to_hbm [thread:$0]  (%p1403_p6), %s699_s8, 128, %s1451_s4, [#allocation5]  }
 0x17b   : > { %1144 = dma.done.wait (%p1403_p6), [#allocation5], 128  }
 0x17c   : > { %1146 = vsyncadd (%p1403_p6), [#allocation5], 4294967168 }
 0x17d PF: > { %s21_s20 = sadd.s32 1, %s1169_s20   ;;  %s1461_s15 = smov %s1153_s16 }
 0x17e   : > { %p18_p13 = scmp.ge.s32.totalorder %s21_s20, 4   ;;  %s1462_s16 = smov %s1157_s17 }
 0x17f   : > { %s1463_s17 = smov %s1253_s27  ;;  %s1464_s18 = smov %s1165_s19 }
 0x180   : > { %s1465_s19 = smov %s1467_s22  ;;  %20 = sbr.rel (!%p18_p13) target bundleno = 7 (0x7), region = 101 }
 0x187   :  { %711 = vsyncpa [#allocation4], 1 }
 0x188   :  { %713 = vsyncpa [#allocation4 + $0x1], 1 }
 0x189   :  { %714 = vsyncpa [#allocation7], 1 }
 0x18a   :  { %716 = vsyncpa [#allocation7 + $0x1], 1 }
 0x18b   :  { %717 = vsyncpa [#allocation5], 1 }
 0x18c   :  { %719 = vsyncpa [#allocation5 + $0x1], 1 }

</bundles_post_ra>
